<compile_context>
chip_gen: v7x
topology: tpu7x:2x2x1
jax: 0.10.0
libtpu: 0.0.40
codegen_flags: <defaults>
</compile_context>

<pallas_src>
import functools

import jax
import jax.numpy as jnp
from jax import lax
from jax.experimental import pallas as pl
from jax.experimental.pallas import tpu as pltpu

NEG_SLOPE = 0.01  # torch.nn.LeakyReLU default negative_slope


def _leaky_relu(x):
    # max(x, a*x) == LeakyReLU for 0 < a < 1  (mul+max: 2 VPU ops vs cmp+sel's 3)
    return jnp.maximum(x, NEG_SLOPE * x)


def _classifier_kernel(x_ref, wcnn_ref, bcnn_ref, wheads_ref, bheads_ref,
                       out_ref, *, seq_len, class_num):
    # x_ref: (blk*S, H) f32 rows for blk batch elements (token 0 still present).
    blk_rows, hidden = x_ref.shape
    blk = blk_rows // seq_len

    # Conv1d(k=1) over channels == rows @ W_cnn^T.  Stream f32 and cast to bf16
    # on-chip (VPU work hides under the MXU); accumulate in f32.
    x_bf = x_ref[...].astype(jnp.bfloat16)
    conv = jnp.dot(x_bf, wcnn_ref[...], preferred_element_type=jnp.float32)
    conv = _leaky_relu(conv + bcnn_ref[...])                     # f32 epilogue

    # Mean over tokens 1..S-1: full-sequence sum (cross-sublane reduce) minus
    # the token-0 row, scaled by 1/(S-1).  No pooling matmul / pool matrix.
    conv3 = conv.reshape(blk, seq_len, hidden)
    pooled = (jnp.sum(conv3, axis=1) - conv3[:, 0, :]) * (1.0 / (seq_len - 1))

    # Fused classifier+regressor heads, kept in f32 (tiny matmul): columns
    # [0:C] logits, [C] regression, [C+1:] zero pad (lane-dense 128-wide
    # output -> unmasked stores).
    heads = jnp.dot(pooled, wheads_ref[...],
                    preferred_element_type=jnp.float32) + bheads_ref[...]

    # LeakyReLU only on the regression column (and the zero pad, a no-op).
    col = lax.broadcasted_iota(jnp.int32, heads.shape, 1)
    out_ref[...] = jnp.where(col >= class_num, _leaky_relu(heads), heads)


def classifier_forward(hidden, w_cnn, b_cnn, w_cls, b_cls, w_reg, b_reg,
                       *, block_b=16):
    """hidden: [B, S, H] f32 backbone output. Returns (logits [B,C], reg [B,1])."""
    B, S, H = hidden.shape
    assert S >= 2, "need at least one non-[CLS] token for the mean pooling"
    C = w_cls.shape[0]
    P = 128 * pl.cdiv(C + 1, 128)          # lane-dense fused-head width
    # NOTE: production H should be a multiple of 128 (ideally 256) so the conv
    # matmul / vector ops don't waste lanes; the tiny demo H=32 is fine.

    # --- wrapper-side layout plumbing (tiny tensors only, one-time, free) ----
    # Fused, pre-transposed f32 head weights: [H, P], cols [0:C]=cls, [C]=reg.
    w_heads = jnp.zeros((H, P), jnp.float32)
    w_heads = w_heads.at[:, :C].set(w_cls.T).at[:, C].set(w_reg[0])
    b_heads = jnp.zeros((1, P), jnp.float32)
    b_heads = b_heads.at[0, :C].set(b_cls).at[0, C].set(b_reg[0])

    wcnn_t = w_cnn.T.astype(jnp.bfloat16)          # [H_in, H_out] bf16 MXU operand
    b_cnn2 = b_cnn.reshape(1, H).astype(jnp.float32)

    # Dominant tensor stays f32 in HBM; contiguous reshape is metadata-only.
    x2d = hidden.reshape(B * S, H)

    # --- VMEM-aware batch-block selection ------------------------------------
    try:
        vmem_cap = int(pltpu.get_tpu_info().vmem_capacity_bytes)
    except Exception:
        vmem_cap = 64 << 20                        # conservative (v7x) fallback
    budget = int(0.85 * vmem_cap)

    # Per-batch-element steady-state bytes: double-buffered f32 input block
    # (2*4), in-kernel bf16 cast temp (2), f32 conv intermediate (4), plus the
    # double-buffered f32 output rows.
    per_b = S * H * (2 * 4 + 2 + 4) + 2 * P * 4
    # Resident (double-buffered) weights/biases + compiler scratch margin.
    fixed = 2 * (H * H * 2 + H * 4 + H * P * 4 + P * 4) + (4 << 20)
    max_fit = max(1, (budget - fixed) // per_b)

    blk = int(min(block_b, B, max_fit))
    if B >= 16:
        # Keep >=2 grid steps: both v7x TensorCores get work and the DMA of
        # block i+1 overlaps the compute of block i.
        blk = min(blk, max(8, ((B // 2) // 8) * 8))
    if blk >= B:
        blk = B                                    # single block == full batch dim
    else:
        blk = max(8, (blk // 8) * 8)               # sublane-aligned partial blocks

    grid = (pl.cdiv(B, blk),)

    vmem_need = blk * per_b + fixed
    vmem_limit = int(min(budget, max(32 << 20, vmem_need)))

    kernel = functools.partial(_classifier_kernel, seq_len=S, class_num=C)

    out = pl.pallas_call(
        kernel,
        out_shape=jax.ShapeDtypeStruct((B, P), jnp.float32),
        grid_spec=pltpu.PrefetchScalarGridSpec(
            num_scalar_prefetch=0,
            grid=grid,
            in_specs=[
                pl.BlockSpec((blk * S, H), lambda b: (b, 0)),   # hidden rows (f32)
                pl.BlockSpec((H, H),       lambda b: (0, 0)),   # conv1d weight^T
                pl.BlockSpec((1, H),       lambda b: (0, 0)),   # conv1d bias
                pl.BlockSpec((H, P),       lambda b: (0, 0)),   # fused head weight
                pl.BlockSpec((1, P),       lambda b: (0, 0)),   # fused head bias
            ],
            out_specs=pl.BlockSpec((blk, P), lambda b: (b, 0)),
        ),
        compiler_params=pltpu.CompilerParams(
            dimension_semantics=("parallel",),     # shards across TCs on v7x
            vmem_limit_bytes=vmem_limit,
        ),
    )(x2d, wcnn_t, b_cnn2, w_heads, b_heads)

    logits = out[:, :C]
    reg = out[:, C:C + 1]      # LeakyReLU already applied in-kernel
    return logits, reg


def _reference(hidden, w_cnn, b_cnn, w_cls, b_cls, w_reg, b_reg):
    x = hidden[:, 1:, :]                                    # [B, S-1, H]
    conv = jnp.einsum('bth,oh->bto', x, w_cnn) + b_cnn      # k=1 conv over channels
    conv = jnp.where(conv > 0, conv, NEG_SLOPE * conv)
    pooled = jnp.mean(conv, axis=1)                         # [B, H]
    logits = pooled @ w_cls.T + b_cls
    reg = pooled @ w_reg.T + b_reg
    reg = jnp.where(reg > 0, reg, NEG_SLOPE * reg)
    return logits, reg


if __name__ == "__main__":
    B, S, H, C = 2, 8, 32, 4

    key = jax.random.PRNGKey(0)
    k_x, k_wc, k_bc, k_wl, k_bl, k_wr, k_br = jax.random.split(key, 7)

    hidden = jax.random.normal(k_x, (B, S, H), dtype=jnp.float32)

    # Conv1d(H, H, kernel_size=1): weight [out, in, 1] -> squeeze to [out, in]
    w_cnn = jax.random.normal(k_wc, (H, H), dtype=jnp.float32) * 0.1
    b_cnn = jax.random.normal(k_bc, (H,), dtype=jnp.float32) * 0.1
    # Linear(H, class_num)
    w_cls = jax.random.normal(k_wl, (C, H), dtype=jnp.float32) * 0.1
    b_cls = jax.random.normal(k_bl, (C,), dtype=jnp.float32) * 0.1
    # Linear(H, 1)
    w_reg = jax.random.normal(k_wr, (1, H), dtype=jnp.float32) * 0.1
    b_reg = jax.random.normal(k_br, (1,), dtype=jnp.float32) * 0.1

    logits, reg = classifier_forward(hidden, w_cnn, b_cnn, w_cls, b_cls,
                                     w_reg, b_reg)
    jax.block_until_ready((logits, reg))

    ref_logits, ref_reg = _reference(hidden, w_cnn, b_cnn, w_cls, b_cls,
                                     w_reg, b_reg)
    # Only the conv matmul uses bf16 operands (f32 accumulation); heads are f32.
    assert jnp.allclose(logits, ref_logits, atol=1e-2, rtol=1e-2)
    assert jnp.allclose(reg, ref_reg, atol=1e-2, rtol=1e-2)
    assert logits.shape == (B, C) and reg.shape == (B, 1)

    print("KERNEL_OK")
</pallas_src>

<mosaic_0001>
module attributes {stable_mosaic.version = 11 : i64} {
  func.func @_classifier_kernel(%arg0: i32, %arg1: memref<16x32xf32, #tpu.memory_space<vmem>>, %arg2: memref<32x32xbf16, #tpu.memory_space<vmem>>, %arg3: memref<1x32xf32, #tpu.memory_space<vmem>>, %arg4: memref<32x128xf32, #tpu.memory_space<vmem>>, %arg5: memref<1x128xf32, #tpu.memory_space<vmem>>, %arg6: memref<2x128xf32, #tpu.memory_space<vmem>>) attributes {dimension_semantics = [#tpu.dimension_semantics<parallel>], iteration_bounds = array<i64: 1>, scalar_prefetch = 0 : i64, scratch_operands = 0 : i64, tpu.core_type = #tpu.core_type<tc>, window_params = [{transform_indices = @transform_0, window_bounds = array<i64: 16, 32>}, {pipeline_mode = #tpu.pipeline_mode<synchronous>, transform_indices = @transform_1, window_bounds = array<i64: 32, 32>}, {pipeline_mode = #tpu.pipeline_mode<synchronous>, transform_indices = @transform_2, window_bounds = array<i64: 1, 32>}, {pipeline_mode = #tpu.pipeline_mode<synchronous>, transform_indices = @transform_3, window_bounds = array<i64: 32, 128>}, {pipeline_mode = #tpu.pipeline_mode<synchronous>, transform_indices = @transform_4, window_bounds = array<i64: 1, 128>}, {transform_indices = @transform_5, window_bounds = array<i64: 2, 128>}]} {
    %c0 = arith.constant 0 : index
    %c0_0 = arith.constant 0 : index
    %0 = vector.load %arg1[%c0, %c0_0] : memref<16x32xf32, #tpu.memory_space<vmem>>, vector<16x32xf32>
    %1 = arith.truncf %0 : vector<16x32xf32> to vector<16x32xbf16>
    %c0_1 = arith.constant 0 : index
    %c0_2 = arith.constant 0 : index
    %2 = vector.load %arg2[%c0_1, %c0_2] : memref<32x32xbf16, #tpu.memory_space<vmem>>, vector<32x32xbf16>
    %cst = arith.constant dense<0.000000e+00> : vector<16x32xf32>
    %3 = tpu.matmul %1, %2, %cst {dimension_numbers = #tpu.dot_dimension_numbers<[1], [0], [0], [1], [0, 0, 1, 1], [], []>} : vector<16x32xbf16>, vector<32x32xbf16>, vector<16x32xf32> -> vector<16x32xf32>
    %c0_3 = arith.constant 0 : index
    %c0_4 = arith.constant 0 : index
    %4 = vector.load %arg3[%c0_3, %c0_4] : memref<1x32xf32, #tpu.memory_space<vmem>>, vector<1x32xf32>
    %5 = vector.broadcast %4 : vector<1x32xf32> to vector<16x32xf32>
    %6 = arith.addf %3, %5 : vector<16x32xf32>
    %cst_5 = arith.constant 0.00999999977 : f32
    %7 = vector.broadcast %cst_5 : f32 to vector<16x32xf32>
    %8 = arith.mulf %7, %6 : vector<16x32xf32>
    %9 = arith.maximumf %6, %8 : vector<16x32xf32>
    %10 = vector.shape_cast %9 : vector<16x32xf32> to vector<2x8x32xf32>
    %cst_6 = arith.constant dense<0.000000e+00> : vector<2x32xf32>
    %11 = vector.multi_reduction <add>, %10, %cst_6 [1] : vector<2x8x32xf32> to vector<2x32xf32>
    %12 = vector.extract_strided_slice %10 {offsets = [0, 0, 0], sizes = [2, 1, 32], strides = [1, 1, 1]} : vector<2x8x32xf32> to vector<2x1x32xf32>
    %13 = vector.shape_cast %12 : vector<2x1x32xf32> to vector<2x32xf32>
    %14 = arith.subf %11, %13 : vector<2x32xf32>
    %cst_7 = arith.constant 0.142857149 : f32
    %15 = vector.broadcast %cst_7 : f32 to vector<2x32xf32>
    %16 = arith.mulf %14, %15 : vector<2x32xf32>
    %c0_8 = arith.constant 0 : index
    %c0_9 = arith.constant 0 : index
    %17 = vector.load %arg4[%c0_8, %c0_9] : memref<32x128xf32, #tpu.memory_space<vmem>>, vector<32x128xf32>
    %cst_10 = arith.constant dense<0.000000e+00> : vector<2x128xf32>
    %18 = tpu.matmul %16, %17, %cst_10 {dimension_numbers = #tpu.dot_dimension_numbers<[1], [0], [0], [1], [0, 0, 1, 1], [], []>} : vector<2x32xf32>, vector<32x128xf32>, vector<2x128xf32> -> vector<2x128xf32>
    %c0_11 = arith.constant 0 : index
    %c0_12 = arith.constant 0 : index
    %19 = vector.load %arg5[%c0_11, %c0_12] : memref<1x128xf32, #tpu.memory_space<vmem>>, vector<1x128xf32>
    %20 = vector.broadcast %19 : vector<1x128xf32> to vector<2x128xf32>
    %21 = arith.addf %18, %20 : vector<2x128xf32>
    %22 = tpu.iota {dimensions = array<i32: 1>} : vector<2x128xi32>
    %c4_i32 = arith.constant 4 : i32
    %23 = vector.broadcast %c4_i32 : i32 to vector<2x128xi32>
    %24 = arith.cmpi sge, %22, %23 : vector<2x128xi32>
    %cst_13 = arith.constant 0.00999999977 : f32
    %25 = vector.broadcast %cst_13 : f32 to vector<2x128xf32>
    %26 = arith.mulf %25, %21 : vector<2x128xf32>
    %27 = arith.maximumf %21, %26 : vector<2x128xf32>
    %28 = arith.select %24, %27, %21 : vector<2x128xi1>, vector<2x128xf32>
    %c0_14 = arith.constant 0 : index
    %c0_15 = arith.constant 0 : index
    %29 = vector.load %arg6[%c0_14, %c0_15] : memref<2x128xf32, #tpu.memory_space<vmem>>, vector<2x128xf32>
    tpu.vector_store %arg6[%c0_14, %c0_15], %28 {strides = array<i32>} : memref<2x128xf32, #tpu.memory_space<vmem>>, vector<2x128xf32>,
    return
  }
  func.func @transform_0(%arg0: i32) -> (i32, i32) {
    %c0_i32 = arith.constant 0 : i32
    %c0_i32_0 = arith.constant 0 : i32
    return %arg0, %c0_i32 : i32, i32
  }
  func.func @transform_1(%arg0: i32) -> (i32, i32) {
    %c0_i32 = arith.constant 0 : i32
    %c0_i32_0 = arith.constant 0 : i32
    %c0_i32_1 = arith.constant 0 : i32
    return %c0_i32, %c0_i32_0 : i32, i32
  }
  func.func @transform_2(%arg0: i32) -> (i32, i32) {
    %c0_i32 = arith.constant 0 : i32
    %c0_i32_0 = arith.constant 0 : i32
    %c0_i32_1 = arith.constant 0 : i32
    return %c0_i32, %c0_i32_0 : i32, i32
  }
  func.func @transform_3(%arg0: i32) -> (i32, i32) {
    %c0_i32 = arith.constant 0 : i32
    %c0_i32_0 = arith.constant 0 : i32
    %c0_i32_1 = arith.constant 0 : i32
    return %c0_i32, %c0_i32_0 : i32, i32
  }
  func.func @transform_4(%arg0: i32) -> (i32, i32) {
    %c0_i32 = arith.constant 0 : i32
    %c0_i32_0 = arith.constant 0 : i32
    %c0_i32_1 = arith.constant 0 : i32
    return %c0_i32, %c0_i32_0 : i32, i32
  }
  func.func @transform_5(%arg0: i32) -> (i32, i32) {
    %c0_i32 = arith.constant 0 : i32
    %c0_i32_0 = arith.constant 0 : i32
    return %arg0, %c0_i32 : i32, i32
  }
}

</mosaic_0001>

<bundles_post_ra>
// kernel: tpu_custom_call.1
= control target key start
LH: loop header
LB: loop body
LE: loop exit
PB: predicated region body
PF: predicated region fallthrough
CT: control target
= control target key end

     0   :  { %10 = vsyncpa [#allocation3], 0  ;;  %s512_s0 = inlined_call_operand.hbm [shape: f32[16,32], index: 0, kind: input, shape index: {}]   ;;  %s513_s1 = inlined_call_operand.hbm [shape: bf16[32,32], index: 1, kind: input, shape index: {}]   ;;  %s514_s2 = inlined_call_operand.vmem [shape: f32[1,32], index: 2, kind: input, shape index: {}]   ;;  %s515_s3 = inlined_call_operand.hbm [shape: f32[32,128], index: 3, kind: input, shape index: {}]   ;;  %s516_s4 = inlined_call_operand.vmem [shape: f32[1,128], index: 4, kind: input, shape index: {}]   ;;  %s517_s5 = inlined_call_operand.hbm [shape: f32[2,128], index: 5, kind: output, shape index: {}]  }
   0x1   :  { %11 = vsyncpa [#allocation6], 0 }
   0x2   :  { %12 = vsyncpa [#allocation4], 0  ;;  %s413_s18 = smov [#allocation5]   ;;  %s319_s22 = scalar_lea.hbm %s513_s1, 256 }
   0x3   :  { %s30_s19 = sshll.u32 %s413_s18, 4  ;;  %p320_p0 = scmp.ne.s32.totalorder %s513_s1, %s319_s22  ;;  %s31_s19 = int_to_ptr.vmem [resolvable:$true] %s30_s19 }
   0x4   :  { %p323_p1 = scmp.lt.u32.totalorder %s319_s22, %s513_s1 }
   0x6   :  { %p325_p2 = pnand %p323_p1, %p320_p0 }
   0x8   :  { %328 = shalt.err (!%p325_p2)
}
   0x9   :  { %s329_s27 = scalar_lea.vmem %s31_s19, 256  ;;  %p334_p4 = scmp.lt.s32.totalorder %s31_s19, %s31_s19 }
   0xa   :  { %p330_p3 = scmp.ne.s32.totalorder %s31_s19, %s329_s27  ;;  %p335_p5 = scmp.lt.s32.totalorder %s329_s27, %s329_s27 }
   0xc   :  { %p336_p6 = por %p335_p5, %p334_p4 }
   0xe   :  { %p337_p7 = pnand %p336_p6, %p330_p3 }
  0x10   :  { %340 = shalt.err (!%p337_p7)
}
  0x11   :  { %s414_s28 = smov 64   ;;  %s415_s29 = smov 4  }
  0x12   :  { %36 = dma.hbm_to_vmem [thread:$0]  %s513_s1, 256, %s31_s19, [#allocation6], %s414_s28, %s414_s28, %s415_s29  }
  0x13   :  { %s416_s7 = smov [#allocation2]   ;;  %s341_s11 = scalar_lea.hbm %s512_s0, 256 }
  0x14   :  { %s18_s8 = sshll.u32 %s416_s7, 4  ;;  %p342_p8 = scmp.ne.s32.totalorder %s512_s0, %s341_s11  ;;  %s19_s8 = int_to_ptr.vmem [resolvable:$true] %s18_s8 }
  0x15   :  { %p345_p9 = scmp.lt.u32.totalorder %s341_s11, %s512_s0 }
  0x17   :  { %p347_p10 = pnand %p345_p9, %p342_p8 }
  0x19   :  { %350 = shalt.err (!%p347_p10)
}
  0x1a   :  { %s351_s16 = scalar_lea.vmem %s19_s8, 256  ;;  %p356_p12 = scmp.lt.s32.totalorder %s19_s8, %s19_s8 }
  0x1b   :  { %p352_p11 = scmp.ne.s32.totalorder %s19_s8, %s351_s16  ;;  %p357_p13 = scmp.lt.s32.totalorder %s351_s16, %s351_s16 }
  0x1d   :  { %p358_p0 = por %p357_p13, %p356_p12 }
  0x1f   :  { %p359_p1 = pnand %p358_p0, %p352_p11 }
  0x21   :  { %362 = shalt.err (!%p359_p1)
}
  0x22   :  { %s417_s1 = smov 128   ;;  %s418_s17 = smov 8  }
  0x23   :  { %24 = dma.hbm_to_vmem [thread:$0]  %s512_s0, 256, %s19_s8, [#allocation3], %s417_s1, %s417_s1, %s418_s17  }
  0x24   :  { %s419_s20 = smov [#allocation7]   ;;  %s363_s24 = scalar_lea.hbm %s515_s3, 512 }
  0x25   :  { %s44_s21 = sshll.u32 %s419_s20, 4  ;;  %p364_p2 = scmp.ne.s32.totalorder %s515_s3, %s363_s24  ;;  %s45_s21 = int_to_ptr.vmem [resolvable:$true] %s44_s21 }
  0x26   :  { %p367_p3 = scmp.lt.u32.totalorder %s363_s24, %s515_s3 }
  0x28   :  { %p369_p4 = pnand %p367_p3, %p364_p2 }
  0x2a   :  { %372 = shalt.err (!%p369_p4)
}
  0x2b   :  { %s373_s29 = scalar_lea.vmem %s45_s21, 512  ;;  %p378_p6 = scmp.lt.s32.totalorder %s45_s21, %s45_s21 }
  0x2c   :  { %p374_p5 = scmp.ne.s32.totalorder %s45_s21, %s373_s29  ;;  %p379_p7 = scmp.lt.s32.totalorder %s373_s29, %s373_s29 }
  0x2e   :  { %p380_p8 = por %p379_p7, %p378_p6 }
  0x30   :  { %p381_p9 = pnand %p380_p8, %p374_p5 }
  0x32   :  { %384 = shalt.err (!%p381_p9)
}
  0x33   :  { %50 = dma.hbm_to_vmem [thread:$0]  %s515_s3, 512, %s45_s21, [#allocation6], %s417_s1, %s417_s1, %s418_s17  }
  0x34   :  { %407 = dma.done.wait [#allocation3], 256  }
  0x35   :  { %408 = vsyncadd [#allocation3], 4294967040 }
  0x36   :  { %409 = dma.done.wait [#allocation6], 768  }
  0x37   :  { %410 = vsyncadd [#allocation6], 4294966528  ;;  %v420_v0 = vmov 0.0   ;;  %vm421_vm0 = vmmov 0   ;;  %v317_v1 = vld [vmem:[#allocation5] sm:$0xff]   ;;  %v318_v2 = vld [vmem:[#allocation5 + $0x8] sm:$0xff]   ;;  %v244_v44 = vlaneseq }
  0x38   :  { %281 = vmatprep.subr.bf16.mxu0 %v420_v0  ;;  %285 = vmatprep.mubr.msk.bf16.mxu0 %vm421_vm0, %v420_v0  ;;  %v63_v3 = vld [vmem:[#allocation2] sm:$0xff]  ;;  %v64_v4 = vld [vmem:[#allocation2 + $0x8] sm:$0xff]  ;;  %vm89_vm1 = vcmask 261120   ;;  %v422_v9 = vmov 0.0|0.0   ;;  %v158_v10 = vld [vmem:[#allocation7 + $0x10] sm:$0xff]  ;;  %vm170_vm2 = vcmask 1041409  }
  0x39   :  { %297 = vmatprep.mubr.msk.f32.mxu1 %vm421_vm0, %v420_v0  ;;  %282 = vmatpush3.bf16.msra.mxu0 %v317_v1  ;;  %v65_v5 = vpack.c.bf16 %v64_v4, %v63_v3  ;;  %v156_v6 = vld [vmem:[#allocation7] sm:$0xff]  ;;  %v157_v7 = vld [vmem:[#allocation7 + $0x8] sm:$0xff]  ;;  %v159_v11 = vld [vmem:[#allocation7 + $0x18] sm:$0xff]  ;;  %v245_v47 = vand.u32 127, %v244_v44  ;;  %s423_s8 = smov [#allocation8]  }
  0x3a   :  { %283 = vmatprep.subr.bf16.mxu0 %v420_v0  ;;  %v301_v8 = vpack.c.bf16 %v157_v7, %v156_v6  ;;  %300 = vmatprep.subr.bf16.mxu1 %v422_v9  ;;  %v304_v12 = vpack.c.bf16 %v159_v11, %v158_v10  ;;  %v267_v13 = vld [vmem:[%s514_s2] ss:$0 sm:$0xff]  ;;  %s257_s9 = sshll.u32 %s423_s8, 4  ;;  %s258_s9 = int_to_ptr.vmem [resolvable:$true] %s257_s9 }
  0x3b   :  { %v271_v45 = vld [vmem:[%s516_s4] ss:$0 sm:$0xff]  ;;  %vm246_vm3 = vcmp.ge.s32.totalorder %v245_v47, 4  ;;  %s385_s10 = scalar_lea.vmem %s258_s9, 32  ;;  %p390_p11 = scmp.lt.s32.totalorder %s258_s9, %s258_s9 }
  0x3c   :  { %302 = vmatpush3.bf16.msra.mxu1 %v301_v8  ;;  %p386_p10 = scmp.ne.s32.totalorder %s258_s9, %s385_s10  ;;  %p391_p12 = scmp.lt.s32.totalorder %s385_s10, %s385_s10 }
  0x3d   :  { %284 = vmatpush3.bf16.msra.mxu0 %v318_v2  ;;  %303 = vmatprep.subr.bf16.mxu1 %v422_v9 }
  0x3e   :  { %p392_p13 = por %p391_p12, %p390_p11 }
  0x40   :  { %286 = vmatmul.mubr.msk.bf16.vlgmr.msra.gmra.mrb[0].mxu0 %vm89_vm1, %v65_v5  ;;  %305 = vmatpush3.bf16.msra.mxu1 %v304_v12  ;;  %p393_p0 = pnand %p392_p13, %p386_p10 }
 0x113   :  { %v127_v14 = vpop.f32.mrb[0].mxu0 }
 0x114   :  { %v128_v15 = vadd.f32 %v267_v13, %v127_v14  ;;  %v287_v16 = vpop.f32.mrb[1].mxu0 }
 0x115   :  { %v130_v17 = vpop.f32.mrb[2].mxu0 }
 0x116   :  { %v134_v18 = vmul.f32 0.01, %v128_v15  ;;  %v131_v19 = vadd.f32 %v267_v13, %v130_v17  ;;  %v288_v20 = vpop.f32.mrb[3].mxu0 }
 0x118   :  { %v136_v21 = vmax.f32 %v128_v15, %v134_v18  ;;  %v135_v22 = vmul.f32 0.01, %v131_v19 }
 0x11a   :  { %v138_v23 = vsel %vm89_vm1, %v136_v21, 0.0  ;;  %v137_v24 = vmax.f32 %v131_v19, %v135_v22 }
 0x11b   :  { %v139_v25 = vrot.slane %v138_v23, 4 }
 0x11c   :  { %v145_v26 = vsel %vm89_vm1, %v137_v24, 0.0 }
 0x11d   :  { %v140_v27 = vadd.f32 %v139_v25, %v138_v23  ;;  %v146_v28 = vrot.slane %v145_v26, 4 }
 0x11f   :  { %v141_v29 = vrot.slane %v140_v27, 2  ;;  %v147_v30 = vadd.f32 %v146_v28, %v145_v26 }
 0x121   :  { %v142_v31 = vadd.f32 %v141_v29, %v140_v27  ;;  %v148_v32 = vrot.slane %v147_v30, 2 }
 0x123   :  { %v143_v33 = vrot.slane %v142_v31, 1  ;;  %v149_v34 = vadd.f32 %v148_v32, %v147_v30 }
 0x125   :  { %v144_v35 = vadd.f32 %v143_v33, %v142_v31  ;;  %v150_v36 = vrot.slane %v149_v34, 1 }
 0x127   :  { %v151_v37 = vadd.f32 %v150_v36, %v149_v34  ;;  %v152_v38 = vsub.f32 %v144_v35, %v136_v21 }
 0x129   :  { %v153_v39 = vsub.f32 %v151_v37, %v137_v24  ;;  %v154_v41 = vmul.f32 0.14285715, %v152_v38 }
 0x12b   :  { %v155_v40 = vmul.f32 0.14285715, %v153_v39 }
 0x12d   :  { %v169_v42 = vrot.slane %v155_v40, 7 }
 0x12f   :  { %v171_v43 = vsel %vm170_vm2, %v169_v42, %v154_v41 }
 0x130   :  { %298 = vmatmul.mubr.msk.f32.vlgmr.msra.gmra.mrb[0].mxu1 %vm89_vm1, %v171_v43 }
 0x203   :  { %v240_v46 = vpop.f32.mrb[0].mxu1 }
 0x204   :  { %v241_v48 = vadd.f32 %v271_v45, %v240_v46  ;;  %v299_v49 = vpop.f32.mrb[1].mxu1 }
 0x206   :  { %v247_v50 = vmul.f32 0.01, %v241_v48 }
 0x208   :  { %v248_v51 = vmax.f32 %v241_v48, %v247_v50 }
 0x20a   :  { %v249_v52 = vsel %vm246_vm3, %v248_v51, %v241_v48 }
 0x20b   :  { %250 = vst [vmem:[#allocation8] sm:$0x3] %v249_v52 }
 0x20c   :  { %396 = shalt.err (!%p393_p0)
}
 0x20d   :  { %s397_s12 = scalar_lea.hbm %s517_s5, 32 }
 0x20e   :  { %p398_p1 = scmp.ne.s32.totalorder %s517_s5, %s397_s12  ;;  %p401_p2 = scmp.lt.u32.totalorder %s397_s12, %s517_s5 }
 0x210   :  { %p403_p3 = pnand %p401_p2, %p398_p1 }
 0x212   :  { %406 = shalt.err (!%p403_p3)
}
 0x213   :  { %260 = dma.vmem_to_hbm [thread:$0]  %s258_s9, 32, %s517_s5, [#allocation4]  }
 0x214   :  { %411 = dma.done.wait [#allocation4], 32  }
 0x215   :  { %412 = vsyncadd [#allocation4], 4294967264 }
 0x216   :  { %264 = vsyncpa [#allocation3], 1 }
 0x217   :  { %265 = vsyncpa [#allocation6], 1 }
 0x218   :  { %266 = vsyncpa [#allocation4], 1 }

</bundles_post_ra>
